<compile_context>
chip_gen: v7x
topology: tpu7x:2x2x1
jax: 0.10.0
libtpu: 0.0.40
codegen_flags: <defaults>
</compile_context>

<pallas_src>
import jax
import jax.numpy as jnp
from jax.experimental import pallas as pl
from jax.experimental.pallas import tpu as pltpu


_LANE = 128          # TPU vreg lane width
_MAX_TILE_ROWS = 512  # per-tile row count: big enough for ~85% HBM roofline,
                      # small enough (4 ops x 2 bufs x 512 x 128 x 4B ~= 2 MiB)
                      # to fit comfortably in v5e/v6e/v7x scoped VMEM.


# ----------------------------- kernels --------------------------------------

def _add_kernel(t1_ref, t2_ref, t3_ref, o_ref):
    o_ref[...] = t1_ref[...] + t2_ref[...] + t3_ref[...]


def _fc_adapted_kernel(w3_ref, t1_ref, t2_ref, t3_ref, o_ref):
    # torch.stack((t1,t2,t3), dim=2) @ fc_adapted.weight^T, squeezed
    # == elementwise weighted sum with the 3 scalar weights (read from SMEM).
    w0 = w3_ref[0]
    w1 = w3_ref[1]
    w2 = w3_ref[2]
    o_ref[...] = w0 * t1_ref[...] + w1 * t2_ref[...] + w2 * t3_ref[...]


def _fc_kernel(t1_ref, t2_ref, t3_ref, wt_ref, b_ref, o_ref):
    # nn.Linear: y = x @ W^T + b.  wt_ref already holds W^T (pre-transposed in
    # the wrapper), so the MXU consumes it directly — no in-kernel transpose.
    s = t1_ref[...] + t2_ref[...] + t3_ref[...]
    y = jnp.dot(s, wt_ref[...], preferred_element_type=jnp.float32)
    o_ref[...] = (y + b_ref[...]).astype(o_ref.dtype)


# ----------------------------- wrappers -------------------------------------

def _row_tile(n_rows):
    return n_rows if n_rows <= _MAX_TILE_ROWS else _MAX_TILE_ROWS


def _run_elementwise(kernel, tunnels, smem_args=()):
    """Row-tiled, lane-dense launcher for the pure-elementwise paths."""
    t1 = tunnels[0]
    orig_shape = t1.shape
    total = t1.size
    if total % _LANE == 0 and total >= _LANE:
        # Lane-dense view: last dim = 128 so output stores are unmasked.
        rows, cols = total // _LANE, _LANE
    else:
        # Fallback: keep the native (N, M) 2-D layout.
        rows, cols = orig_shape

    xs = [t.reshape(rows, cols) for t in tunnels]
    tile = _row_tile(rows)
    grid = (pl.cdiv(rows, tile),)

    vspec = pl.BlockSpec((tile, cols), lambda i: (i, 0))
    smem_specs = [pl.BlockSpec(memory_space=pltpu.MemorySpace.SMEM)] * len(smem_args)

    out = pl.pallas_call(
        kernel,
        out_shape=jax.ShapeDtypeStruct((rows, cols), t1.dtype),
        grid=grid,
        in_specs=smem_specs + [vspec] * len(xs),
        out_specs=vspec,
        compiler_params=pltpu.CompilerParams(dimension_semantics=("parallel",)),
    )(*smem_args, *xs)
    return out.reshape(orig_shape)


def _pallas_add(t1, t2, t3):
    return _run_elementwise(_add_kernel, (t1, t2, t3))


def _pallas_fc_adapted(t1, t2, t3, w3):
    # w3: nn.Linear(3, 1, bias=False).weight of shape (1, 3) -> flat SMEM scalars.
    return _run_elementwise(_fc_adapted_kernel, (t1, t2, t3),
                            smem_args=(w3.reshape(3),))


def _pallas_fc(t1, t2, t3, w, b):
    n, m = t1.shape
    tile = _row_tile(n)
    grid = (pl.cdiv(n, tile),)

    wt = w.T               # transpose hoisted to the wrapper (done once by XLA)
    b2d = b.reshape(1, m)  # keep bias 2-D for a clean VMEM layout

    io_spec = pl.BlockSpec((tile, m), lambda i: (i, 0))
    # Constant index_map -> weight/bias stay resident in VMEM across the N grid.
    w_spec = pl.BlockSpec((m, m), lambda i: (0, 0))
    b_spec = pl.BlockSpec((1, m), lambda i: (0, 0))

    return pl.pallas_call(
        _fc_kernel,
        out_shape=jax.ShapeDtypeStruct((n, m), t1.dtype),
        grid=grid,
        in_specs=[io_spec, io_spec, io_spec, w_spec, b_spec],
        out_specs=io_spec,
        compiler_params=pltpu.CompilerParams(dimension_semantics=("parallel",)),
    )(t1, t2, t3, wt, b2d)


class DecisionBlock:
    """JAX/Pallas port of Decision_block."""

    def __init__(self, decision_way="add", data_encoder_output_dim=32,
                 key=jax.random.PRNGKey(0)):
        self.decision_way = decision_way
        d = data_encoder_output_dim
        k1, k2, k3, k4, k5 = jax.random.split(key, 5)
        bound_fc = 1.0 / jnp.sqrt(d)
        bound_ad = 1.0 / jnp.sqrt(3.0)
        # nn.Linear(d, d)
        self.fc_w = jax.random.uniform(k1, (d, d), jnp.float32, -bound_fc, bound_fc)
        self.fc_b = jax.random.uniform(k2, (d,), jnp.float32, -bound_fc, bound_fc)
        # nn.Linear(3, 1, bias=False)
        self.fc_adapted_w = jax.random.uniform(k3, (1, 3), jnp.float32, -bound_ad, bound_ad)
        # nn.Linear(d, d) -- declared in __init__ but unused in forward (kept for parity)
        self.fc_adapted_2_w = jax.random.uniform(k4, (d, d), jnp.float32, -bound_fc, bound_fc)
        self.fc_adapted_2_b = jax.random.uniform(k5, (d,), jnp.float32, -bound_fc, bound_fc)

    def __call__(self, rule_tunnel, data_tunnel, similarity_tunnel):
        if self.decision_way == "add":
            out = _pallas_add(rule_tunnel, data_tunnel, similarity_tunnel)
            return out, None
        if self.decision_way == "fc":
            out = _pallas_fc(rule_tunnel, data_tunnel, similarity_tunnel,
                             self.fc_w, self.fc_b)
            return out, None
        if self.decision_way == "fc_adapted":
            out = _pallas_fc_adapted(rule_tunnel, data_tunnel, similarity_tunnel,
                                     self.fc_adapted_w)
            return out, self.fc_adapted_w
        raise ValueError(f"unknown decision_way: {self.decision_way}")


# ------------------------------- main ---------------------------------------

if __name__ == "__main__":
    key = jax.random.PRNGKey(0)
    kx1, kx2, kx3, kparam, ky1, ky2, ky3 = jax.random.split(key, 7)

    N, M = 8, 32  # N samples, M = DataEncoder_Output_Dim
    rule_tunnel = jax.random.normal(kx1, (N, M), jnp.float32)
    data_tunnel = jax.random.normal(kx2, (N, M), jnp.float32)
    similarity_tunnel = jax.random.normal(kx3, (N, M), jnp.float32)

    # 'add' path (module default)
    block_add = DecisionBlock("add", M, key=kparam)
    out_add, aux_add = block_add(rule_tunnel, data_tunnel, similarity_tunnel)
    out_add = jax.block_until_ready(out_add)
    ref_add = rule_tunnel + data_tunnel + similarity_tunnel
    assert aux_add is None
    assert jnp.allclose(out_add, ref_add, atol=1e-5, rtol=1e-5)

    # 'fc' path
    block_fc = DecisionBlock("fc", M, key=kparam)
    out_fc, aux_fc = block_fc(rule_tunnel, data_tunnel, similarity_tunnel)
    out_fc = jax.block_until_ready(out_fc)
    s = rule_tunnel + data_tunnel + similarity_tunnel
    ref_fc = s @ block_fc.fc_w.T + block_fc.fc_b
    assert aux_fc is None
    assert jnp.allclose(out_fc, ref_fc, atol=1e-4, rtol=1e-4)

    # 'fc_adapted' path
    block_ad = DecisionBlock("fc_adapted", M, key=kparam)
    out_ad, w_ad = block_ad(rule_tunnel, data_tunnel, similarity_tunnel)
    out_ad = jax.block_until_ready(out_ad)
    w = block_ad.fc_adapted_w.reshape(3)
    ref_ad = w[0] * rule_tunnel + w[1] * data_tunnel + w[2] * similarity_tunnel
    assert w_ad.shape == (1, 3)
    assert jnp.allclose(out_ad, ref_ad, atol=1e-5, rtol=1e-5)

    # Larger N exercises the lane-dense reshape + row-tiled grid on all paths.
    N2 = 48
    r2 = jax.random.normal(ky1, (N2, M), jnp.float32)
    d2 = jax.random.normal(ky2, (N2, M), jnp.float32)
    s2 = jax.random.normal(ky3, (N2, M), jnp.float32)
    out2, _ = block_add(r2, d2, s2)
    assert jnp.allclose(jax.block_until_ready(out2), r2 + d2 + s2, atol=1e-5, rtol=1e-5)
    out3, _ = block_fc(r2, d2, s2)
    assert jnp.allclose(jax.block_until_ready(out3),
                        (r2 + d2 + s2) @ block_fc.fc_w.T + block_fc.fc_b,
                        atol=1e-4, rtol=1e-4)
    out4, _ = block_ad(r2, d2, s2)
    assert jnp.allclose(jax.block_until_ready(out4),
                        w[0] * r2 + w[1] * d2 + w[2] * s2, atol=1e-5, rtol=1e-5)

    print("KERNEL_OK")
</pallas_src>

<mosaic_0001>
module attributes {stable_mosaic.version = 11 : i64} {
  func.func @_add_kernel(%arg0: i32, %arg1: memref<2x128xf32, #tpu.memory_space<vmem>>, %arg2: memref<2x128xf32, #tpu.memory_space<vmem>>, %arg3: memref<2x128xf32, #tpu.memory_space<vmem>>, %arg4: memref<2x128xf32, #tpu.memory_space<vmem>>) attributes {dimension_semantics = [#tpu.dimension_semantics<parallel>], iteration_bounds = array<i64: 1>, scalar_prefetch = 0 : i64, scratch_operands = 0 : i64, tpu.core_type = #tpu.core_type<tc>, window_params = [{transform_indices = @transform_0, window_bounds = array<i64: 2, 128>}, {transform_indices = @transform_1, window_bounds = array<i64: 2, 128>}, {transform_indices = @transform_2, window_bounds = array<i64: 2, 128>}, {transform_indices = @transform_3, window_bounds = array<i64: 2, 128>}]} {
    %c0 = arith.constant 0 : index
    %c0_0 = arith.constant 0 : index
    %0 = vector.load %arg1[%c0, %c0_0] : memref<2x128xf32, #tpu.memory_space<vmem>>, vector<2x128xf32>
    %c0_1 = arith.constant 0 : index
    %c0_2 = arith.constant 0 : index
    %1 = vector.load %arg2[%c0_1, %c0_2] : memref<2x128xf32, #tpu.memory_space<vmem>>, vector<2x128xf32>
    %2 = arith.addf %0, %1 : vector<2x128xf32>
    %c0_3 = arith.constant 0 : index
    %c0_4 = arith.constant 0 : index
    %3 = vector.load %arg3[%c0_3, %c0_4] : memref<2x128xf32, #tpu.memory_space<vmem>>, vector<2x128xf32>
    %4 = arith.addf %2, %3 : vector<2x128xf32>
    %c0_5 = arith.constant 0 : index
    %c0_6 = arith.constant 0 : index
    %5 = vector.load %arg4[%c0_5, %c0_6] : memref<2x128xf32, #tpu.memory_space<vmem>>, vector<2x128xf32>
    tpu.vector_store %arg4[%c0_5, %c0_6], %4 {strides = array<i32>} : memref<2x128xf32, #tpu.memory_space<vmem>>, vector<2x128xf32>,
    return
  }
  func.func @transform_0(%arg0: i32) -> (i32, i32) {
    %c0_i32 = arith.constant 0 : i32
    %c0_i32_0 = arith.constant 0 : i32
    return %arg0, %c0_i32 : i32, i32
  }
  func.func @transform_1(%arg0: i32) -> (i32, i32) {
    %c0_i32 = arith.constant 0 : i32
    %c0_i32_0 = arith.constant 0 : i32
    return %arg0, %c0_i32 : i32, i32
  }
  func.func @transform_2(%arg0: i32) -> (i32, i32) {
    %c0_i32 = arith.constant 0 : i32
    %c0_i32_0 = arith.constant 0 : i32
    return %arg0, %c0_i32 : i32, i32
  }
  func.func @transform_3(%arg0: i32) -> (i32, i32) {
    %c0_i32 = arith.constant 0 : i32
    %c0_i32_0 = arith.constant 0 : i32
    return %arg0, %c0_i32 : i32, i32
  }
}

</mosaic_0001>

<bundles_post_ra>
// kernel: tpu_custom_call.1
= control target key start
LH: loop header
LB: loop body
LE: loop exit
PB: predicated region body
PF: predicated region fallthrough
CT: control target
= control target key end

     0   :  { %8 = vsyncpa [#allocation3], 0  ;;  %s150_s0 = inlined_call_operand.hbm [shape: f32[2,128], index: 0, kind: input, shape index: {}]   ;;  %s151_s1 = inlined_call_operand.vmem [shape: f32[2,128], index: 1, kind: input, shape index: {}]   ;;  %s152_s2 = inlined_call_operand.vmem [shape: f32[2,128], index: 2, kind: input, shape index: {}]   ;;  %s153_s3 = inlined_call_operand.hbm [shape: f32[2,128], index: 3, kind: output, shape index: {}]  }
   0x1   :  { %9 = vsyncpa [#allocation4], 0  ;;  %s98_s12 = smov [#allocation2]   ;;  %s50_s16 = scalar_lea.hbm %s150_s0, 32 }
   0x2   :  { %s16_s13 = sshll.u32 %s98_s12, 4  ;;  %p51_p0 = scmp.ne.s32.totalorder %s150_s0, %s50_s16  ;;  %s17_s13 = int_to_ptr.vmem [resolvable:$true] %s16_s13 }
   0x3   :  { %p54_p1 = scmp.lt.u32.totalorder %s50_s16, %s150_s0 }
   0x5   :  { %p56_p2 = pnand %p54_p1, %p51_p0 }
   0x7   :  { %59 = shalt.err (!%p56_p2)
}
   0x8   :  { %s60_s21 = scalar_lea.vmem %s17_s13, 32  ;;  %p65_p4 = scmp.lt.s32.totalorder %s17_s13, %s17_s13 }
   0x9   :  { %p61_p3 = scmp.ne.s32.totalorder %s17_s13, %s60_s21  ;;  %p66_p5 = scmp.lt.s32.totalorder %s60_s21, %s60_s21 }
   0xb   :  { %p67_p6 = por %p66_p5, %p65_p4 }
   0xd   :  { %p68_p7 = pnand %p67_p6, %p61_p3 }
   0xf   :  { %71 = shalt.err (!%p68_p7)
}
  0x10   :  { %19 = dma.hbm_to_vmem [thread:$0]  %s150_s0, 32, %s17_s13, [#allocation3]  }
  0x11   :  { %94 = dma.done.wait [#allocation3], 32  }
  0x12   :  { %95 = vsyncadd [#allocation3], 4294967264  ;;  %s99_s24 = smov [#allocation5]   ;;  %v27_v0 = vld [vmem:[#allocation2] sm:$0x3] }
  0x13   :  { %s39_s25 = sshll.u32 %s99_s24, 4  ;;  %v28_v1 = vld [vmem:[%s151_s1] sm:$0x3]  ;;  %s40_s25 = int_to_ptr.vmem [resolvable:$true] %s39_s25 }
  0x14   :  { %v30_v2 = vld [vmem:[%s152_s2] sm:$0x3]  ;;  %v29_v3 = vadd.f32 %v28_v1, %v27_v0  ;;  %s72_s30 = scalar_lea.vmem %s40_s25, 32  ;;  %p77_p9 = scmp.lt.s32.totalorder %s40_s25, %s40_s25 }
  0x15   :  { %p73_p8 = scmp.ne.s32.totalorder %s40_s25, %s72_s30  ;;  %p78_p10 = scmp.lt.s32.totalorder %s72_s30, %s72_s30 }
  0x16   :  { %v31_v4 = vadd.f32 %v30_v2, %v29_v3 }
  0x17   :  { %p79_p11 = por %p78_p10, %p77_p9 }
  0x18   :  { %32 = vst [vmem:[#allocation5] sm:$0x3] %v31_v4 }
  0x19   :  { %p80_p12 = pnand %p79_p11, %p73_p8 }
  0x1b   :  { %83 = shalt.err (!%p80_p12)
}
  0x1c   :  { %s84_s5 = scalar_lea.hbm %s153_s3, 32 }
  0x1d   :  { %p85_p13 = scmp.ne.s32.totalorder %s153_s3, %s84_s5  ;;  %p88_p0 = scmp.lt.u32.totalorder %s84_s5, %s153_s3 }
  0x1f   :  { %p90_p1 = pnand %p88_p0, %p85_p13 }
  0x21   :  { %93 = shalt.err (!%p90_p1)
}
  0x22   :  { %42 = dma.vmem_to_hbm [thread:$0]  %s40_s25, 32, %s153_s3, [#allocation4]  }
  0x23   :  { %96 = dma.done.wait [#allocation4], 32  }
  0x24   :  { %97 = vsyncadd [#allocation4], 4294967264 }
  0x25   :  { %46 = vsyncpa [#allocation3], 1 }
  0x26   :  { %47 = vsyncpa [#allocation4], 1 }

</bundles_post_ra>
